<compile_context>
chip_gen: v7x
topology: tpu7x:2x2x1
jax: 0.10.0
libtpu: 0.0.40
codegen_flags: <defaults>
</compile_context>

<pallas_src>
import functools
from numbers import Number

import jax
import jax.numpy as jnp
from jax.experimental import pallas as pl
from jax.experimental.pallas import tpu as pltpu


_LANE = 128     # last-dim tile width (vreg lanes)
_SUBLANE = 8    # second-to-last dim tile width (f32 sublanes)


def _round_up(n, m):
    return ((n + m - 1) // m) * m


def _apply_activation(y, act, slope):
    if act == "lrelu":
        return jnp.where(y >= 0, y, slope * y)
    if act == "xtanh":
        return jnp.tanh(y) + slope * y
    if act == "sigmoid":
        return jax.nn.sigmoid(y)
    if act == "none":
        return y
    raise ValueError(f"Incorrect activation: {act}")


# ----------------------------------------------------------------------------
# Fused Pallas kernel: whole MLP in one invocation.
#   x_ref : f32  (batch, in_dim8)        -- native input (cast to bf16 here)
#   w_ref : bf16 (n_layers, P, P)        -- zero-padded, stacked weights
#   b_ref : f32  (n_layers, 1, P)        -- zero-padded, stacked biases
#   o_ref : f32  (batch, P)
# ----------------------------------------------------------------------------
def _fused_mlp_kernel(x_ref, w_ref, b_ref, o_ref, *, activations, slope, in_dim8):
    n_layers = len(activations)
    h = x_ref[...]                                     # f32 (batch, in_dim8)
    for i in range(n_layers):
        if i == 0:
            # Layer 0 consumes only the real (8-aligned) input rows of the
            # stacked weight -- avoids lane-padding the activations.
            w = w_ref[0, :in_dim8, :]                  # bf16 (in_dim8, P)
        else:
            w = w_ref[i]                               # bf16 (P, P)
        b = b_ref[i]                                   # f32  (1, P)
        y = jnp.dot(h.astype(jnp.bfloat16), w,
                    preferred_element_type=jnp.float32) + b
        h = _apply_activation(y, activations[i], slope)    # stays f32
    o_ref[...] = h.astype(o_ref.dtype)


def fused_mlp_forward(x, w_stack, b_stack, activations, slope,
                      output_dim, true_dims):
    """Single pallas_call for the whole MLP.

    w_stack: bf16 (n_layers, P, P), zero-padded per layer.
    b_stack: f32  (n_layers, 1, P), zero-padded per layer.
    true_dims: list of (din, dout) real layer dims, for the cost estimate.
    """
    batch, in_dim = x.shape
    P = w_stack.shape[-1]

    # Keep x native; only round the contraction dim up to a sublane multiple
    # (no-op for the shapes used here) so the layer-0 weight slice is aligned.
    in_dim8 = _round_up(in_dim, _SUBLANE)
    if in_dim8 != in_dim:
        x = jnp.pad(x, ((0, 0), (0, in_dim8 - in_dim)))

    in_specs = [
        pl.BlockSpec(x.shape, lambda: (0, 0)),
        pl.BlockSpec(w_stack.shape, lambda: (0, 0, 0)),
        pl.BlockSpec(b_stack.shape, lambda: (0, 0, 0)),
    ]
    out_spec = pl.BlockSpec((batch, P), lambda: (0, 0))

    # Advisory cost: use TRUE layer dims, not padded ones.
    flops = sum(2 * batch * din * dout for (din, dout) in true_dims)
    transcendentals = sum(batch * dout
                          for (_, dout), act in zip(true_dims, activations)
                          if act in ("xtanh", "sigmoid"))
    bytes_accessed = (x.size * x.dtype.itemsize
                      + w_stack.size * w_stack.dtype.itemsize
                      + b_stack.size * b_stack.dtype.itemsize
                      + batch * P * 4)

    kernel = functools.partial(_fused_mlp_kernel,
                               activations=tuple(activations),
                               slope=slope, in_dim8=in_dim8)

    out_p = pl.pallas_call(
        kernel,
        out_shape=jax.ShapeDtypeStruct((batch, P), jnp.float32),
        in_specs=in_specs,
        out_specs=out_spec,
        cost_estimate=pl.CostEstimate(flops=flops,
                                      transcendentals=transcendentals,
                                      bytes_accessed=bytes_accessed),
        compiler_params=pltpu.CompilerParams(vmem_limit_bytes=32 * 1024 * 1024),
    )(x, w_stack, b_stack)
    return out_p[:, :output_dim]


# ----------------------------------------------------------------------------
# MLP module (parameters built deterministically in-script)
# ----------------------------------------------------------------------------
class MLP:
    def __init__(self, input_dim, output_dim, hidden_dim, n_layers,
                 activation="none", slope=0.1, key=None):
        self.input_dim = input_dim
        self.output_dim = output_dim
        self.n_layers = n_layers
        self.slope = slope

        if isinstance(hidden_dim, Number):
            self.hidden_dim = [hidden_dim] * (n_layers - 1)
        elif isinstance(hidden_dim, list):
            self.hidden_dim = hidden_dim
        else:
            raise ValueError(f"Wrong argument type for hidden_dim: {hidden_dim}")

        if isinstance(activation, str):
            self.activation = [activation] * (n_layers - 1)
        elif isinstance(activation, list):
            self.activation = activation
        else:
            raise ValueError(f"Wrong argument type for activation: {activation}")

        # Per-layer activation (last layer has none), used by the fused kernel.
        self.layer_activations = list(self.activation[: n_layers - 1]) + ["none"]

        # layer dimensions: in -> hidden... -> out
        if n_layers == 1:
            dims = [(input_dim, output_dim)]
        else:
            dims = [(input_dim, self.hidden_dim[0])]
            for i in range(1, n_layers - 1):
                dims.append((self.hidden_dim[i - 1], self.hidden_dim[i]))
            dims.append((self.hidden_dim[n_layers - 2], output_dim))
        self.dims = dims

        # Common padded feature width for the stacked weight tensor.
        all_feats = [input_dim, output_dim] + list(self.hidden_dim)
        P = _round_up(max(all_feats), _LANE)
        self.padded_width = P

        # deterministic init (Kaiming-uniform-like, as in nn.Linear defaults)
        if key is None:
            key = jax.random.PRNGKey(0)
        self.params = []            # raw f32 params (reference / semantics)
        w_padded, b_padded = [], []
        for (din, dout) in dims:
            key, kw, kb = jax.random.split(key, 3)
            bound = 1.0 / jnp.sqrt(din)
            w = jax.random.uniform(kw, (din, dout), jnp.float32, -bound, bound)
            b = jax.random.uniform(kb, (dout,), jnp.float32, -bound, bound)
            self.params.append((w, b))

            # Zero padding of weight rows/cols and bias lanes is REQUIRED for
            # correctness of the fused padded-lane scheme (see header comment).
            w_p = jnp.pad(w, ((0, P - din), (0, P - dout))).astype(jnp.bfloat16)
            b_p = jnp.pad(b, (0, P - dout)).reshape(1, P).astype(jnp.float32)
            w_padded.append(w_p)
            b_padded.append(b_p)

        # Stack once at init: 2 operands instead of 2*n_layers tiny DMAs.
        self.w_stack = jnp.stack(w_padded, axis=0)   # bf16 (L, P, P)
        self.b_stack = jnp.stack(b_padded, axis=0)   # f32  (L, 1, P)

    def __call__(self, x):
        return fused_mlp_forward(x, self.w_stack, self.b_stack,
                                 self.layer_activations, self.slope,
                                 self.output_dim, self.dims)


# Pure-JAX f32 reference for a correctness check (mirrors the PyTorch forward).
def _ref_forward(mlp, x):
    h = x
    for c in range(mlp.n_layers):
        w, b = mlp.params[c]
        h = h @ w + b
        if c != mlp.n_layers - 1:
            act = mlp.layer_activations[c]
            if act == "lrelu":
                h = jnp.where(h >= 0, h, mlp.slope * h)
            elif act == "xtanh":
                h = jnp.tanh(h) + mlp.slope * h
            elif act == "sigmoid":
                h = jax.nn.sigmoid(h)
    return h


if __name__ == "__main__":
    key = jax.random.PRNGKey(0)
    kx, kp = jax.random.split(key)

    batch, input_dim, hidden_dim, output_dim, n_layers = 8, 16, 32, 8, 3
    x = jax.random.normal(kx, (batch, input_dim), dtype=jnp.float32)

    mlp = MLP(input_dim, output_dim, hidden_dim, n_layers,
              activation="lrelu", slope=0.1, key=kp)

    out = jax.block_until_ready(mlp(x))
    ref = _ref_forward(mlp, x)

    assert out.shape == (batch, output_dim)
    max_err = float(jnp.max(jnp.abs(out - ref)))
    # bf16 matmul inputs + f32 accumulation vs. pure-f32 reference.
    assert jnp.allclose(out, ref, atol=5e-2, rtol=5e-2), f"max_err={max_err}"

    print("KERNEL_OK")
</pallas_src>

<mosaic_0001>
module attributes {stable_mosaic.version = 11 : i64} {
  func.func @_fused_mlp_kernel(%arg0: memref<8x16xf32, #tpu.memory_space<vmem>>, %arg1: memref<3x128x128xbf16, #tpu.memory_space<vmem>>, %arg2: memref<3x1x128xf32, #tpu.memory_space<vmem>>, %arg3: memref<8x128xf32, #tpu.memory_space<vmem>>) attributes {dimension_semantics = [], scalar_prefetch = 0 : i64, scratch_operands = 0 : i64, tpu.core_type = #tpu.core_type<tc>} {
    %c0 = arith.constant 0 : index
    %c0_0 = arith.constant 0 : index
    %0 = vector.load %arg0[%c0, %c0_0] : memref<8x16xf32, #tpu.memory_space<vmem>>, vector<8x16xf32>
    %c0_1 = arith.constant 0 : index
    %c0_2 = arith.constant 0 : index
    %c0_3 = arith.constant 0 : index
    %1 = vector.load %arg1[%c0_1, %c0_2, %c0_3] : memref<3x128x128xbf16, #tpu.memory_space<vmem>>, vector<1x16x128xbf16>
    %2 = vector.shape_cast %1 : vector<1x16x128xbf16> to vector<16x128xbf16>
    %c0_4 = arith.constant 0 : index
    %c0_5 = arith.constant 0 : index
    %c0_6 = arith.constant 0 : index
    %3 = vector.load %arg2[%c0_4, %c0_5, %c0_6] : memref<3x1x128xf32, #tpu.memory_space<vmem>>, vector<1x1x128xf32>
    %4 = vector.shape_cast %3 : vector<1x1x128xf32> to vector<1x128xf32>
    %5 = arith.truncf %0 : vector<8x16xf32> to vector<8x16xbf16>
    %cst = arith.constant dense<0.000000e+00> : vector<8x128xf32>
    %6 = tpu.matmul %5, %2, %cst {dimension_numbers = #tpu.dot_dimension_numbers<[1], [0], [0], [1], [0, 0, 1, 1], [], []>} : vector<8x16xbf16>, vector<16x128xbf16>, vector<8x128xf32> -> vector<8x128xf32>
    %7 = vector.broadcast %4 : vector<1x128xf32> to vector<8x128xf32>
    %8 = arith.addf %6, %7 : vector<8x128xf32>
    %cst_7 = arith.constant 0.000000e+00 : f32
    %9 = vector.broadcast %cst_7 : f32 to vector<8x128xf32>
    %10 = arith.cmpf oge, %8, %9 : vector<8x128xf32>
    %cst_8 = arith.constant 1.000000e-01 : f32
    %11 = vector.broadcast %cst_8 : f32 to vector<8x128xf32>
    %12 = arith.mulf %11, %8 : vector<8x128xf32>
    %13 = arith.select %10, %8, %12 : vector<8x128xi1>, vector<8x128xf32>
    %c1 = arith.constant 1 : index
    %c0_9 = arith.constant 0 : index
    %c0_10 = arith.constant 0 : index
    %14 = vector.load %arg1[%c1, %c0_9, %c0_10] : memref<3x128x128xbf16, #tpu.memory_space<vmem>>, vector<1x128x128xbf16>
    %15 = vector.shape_cast %14 : vector<1x128x128xbf16> to vector<128x128xbf16>
    %c1_11 = arith.constant 1 : index
    %c0_12 = arith.constant 0 : index
    %c0_13 = arith.constant 0 : index
    %16 = vector.load %arg2[%c1_11, %c0_12, %c0_13] : memref<3x1x128xf32, #tpu.memory_space<vmem>>, vector<1x1x128xf32>
    %17 = vector.shape_cast %16 : vector<1x1x128xf32> to vector<1x128xf32>
    %18 = arith.truncf %13 : vector<8x128xf32> to vector<8x128xbf16>
    %cst_14 = arith.constant dense<0.000000e+00> : vector<8x128xf32>
    %19 = tpu.matmul %18, %15, %cst_14 {dimension_numbers = #tpu.dot_dimension_numbers<[1], [0], [0], [1], [0, 0, 1, 1], [], []>} : vector<8x128xbf16>, vector<128x128xbf16>, vector<8x128xf32> -> vector<8x128xf32>
    %20 = vector.broadcast %17 : vector<1x128xf32> to vector<8x128xf32>
    %21 = arith.addf %19, %20 : vector<8x128xf32>
    %cst_15 = arith.constant 0.000000e+00 : f32
    %22 = vector.broadcast %cst_15 : f32 to vector<8x128xf32>
    %23 = arith.cmpf oge, %21, %22 : vector<8x128xf32>
    %cst_16 = arith.constant 1.000000e-01 : f32
    %24 = vector.broadcast %cst_16 : f32 to vector<8x128xf32>
    %25 = arith.mulf %24, %21 : vector<8x128xf32>
    %26 = arith.select %23, %21, %25 : vector<8x128xi1>, vector<8x128xf32>
    %c2 = arith.constant 2 : index
    %c0_17 = arith.constant 0 : index
    %c0_18 = arith.constant 0 : index
    %27 = vector.load %arg1[%c2, %c0_17, %c0_18] : memref<3x128x128xbf16, #tpu.memory_space<vmem>>, vector<1x128x128xbf16>
    %28 = vector.shape_cast %27 : vector<1x128x128xbf16> to vector<128x128xbf16>
    %c2_19 = arith.constant 2 : index
    %c0_20 = arith.constant 0 : index
    %c0_21 = arith.constant 0 : index
    %29 = vector.load %arg2[%c2_19, %c0_20, %c0_21] : memref<3x1x128xf32, #tpu.memory_space<vmem>>, vector<1x1x128xf32>
    %30 = vector.shape_cast %29 : vector<1x1x128xf32> to vector<1x128xf32>
    %31 = arith.truncf %26 : vector<8x128xf32> to vector<8x128xbf16>
    %cst_22 = arith.constant dense<0.000000e+00> : vector<8x128xf32>
    %32 = tpu.matmul %31, %28, %cst_22 {dimension_numbers = #tpu.dot_dimension_numbers<[1], [0], [0], [1], [0, 0, 1, 1], [], []>} : vector<8x128xbf16>, vector<128x128xbf16>, vector<8x128xf32> -> vector<8x128xf32>
    %33 = vector.broadcast %30 : vector<1x128xf32> to vector<8x128xf32>
    %34 = arith.addf %32, %33 : vector<8x128xf32>
    %c0_23 = arith.constant 0 : index
    %c0_24 = arith.constant 0 : index
    %35 = vector.load %arg3[%c0_23, %c0_24] : memref<8x128xf32, #tpu.memory_space<vmem>>, vector<8x128xf32>
    tpu.vector_store %arg3[%c0_23, %c0_24], %34 {strides = array<i32>} : memref<8x128xf32, #tpu.memory_space<vmem>>, vector<8x128xf32>,
    return
  }
}

</mosaic_0001>

<bundles_post_ra>
// kernel: tpu_custom_call.1
= control target key start
LH: loop header
LB: loop body
LE: loop exit
PB: predicated region body
PF: predicated region fallthrough
CT: control target
= control target key end

     0   :  { %8 = vsyncpa [#allocation3], 0  ;;  %s638_s0 = inlined_call_operand.hbm [shape: f32[8,16], index: 0, kind: input, shape index: {}]   ;;  %s639_s1 = inlined_call_operand.hbm [shape: bf16[3,128,128], index: 1, kind: input, shape index: {}]   ;;  %s640_s2 = inlined_call_operand.vmem [shape: f32[3,1,128], index: 2, kind: input, shape index: {}]   ;;  %s641_s3 = inlined_call_operand.hbm [shape: f32[8,128], index: 3, kind: output, shape index: {}]  }
   0x1   :  { %9 = vsyncpa [#allocation6], 0 }
   0x2   :  { %10 = vsyncpa [#allocation4], 0  ;;  %s539_s12 = smov [#allocation2]   ;;  %s540_s14 = smov [#allocation5]  }
   0x3   :  { %s17_s13 = sshll.u32 %s539_s12, 4  ;;  %s26_s15 = sshll.u32 %s540_s14, 4  ;;  %s18_s13 = int_to_ptr.vmem [resolvable:$true] %s17_s13  ;;  %s566_s15 = int_to_ptr.vmem [resolvable:$true] %s26_s15 }
   0x4   :  { %s467_s18 = scalar_lea.hbm %s638_s0, 128 }
   0x5   :  { %p468_p0 = scmp.ne.s32.totalorder %s638_s0, %s467_s18  ;;  %p471_p1 = scmp.lt.u32.totalorder %s467_s18, %s638_s0 }
   0x7   :  { %p473_p2 = pnand %p471_p1, %p468_p0 }
   0x9   :  { %476 = shalt.err (!%p473_p2)
}
   0xa   :  { %s477_s23 = scalar_lea.vmem %s18_s13, 128  ;;  %p482_p4 = scmp.lt.s32.totalorder %s18_s13, %s18_s13 }
   0xb   :  { %p478_p3 = scmp.ne.s32.totalorder %s18_s13, %s477_s23  ;;  %p483_p5 = scmp.lt.s32.totalorder %s477_s23, %s477_s23 }
   0xd   :  { %p484_p6 = por %p483_p5, %p482_p4 }
   0xf   :  { %p485_p7 = pnand %p484_p6, %p478_p3 }
  0x11   :  { %488 = shalt.err (!%p485_p7)
}
  0x12   :  { %20 = dma.hbm_to_vmem [thread:$0]  %s638_s0, 128, %s18_s13, [#allocation3]  }
  0x13   :  { %s489_s28 = scalar_lea.hbm %s639_s1, 3072 }
  0x14   :  { %p490_p8 = scmp.ne.s32.totalorder %s639_s1, %s489_s28  ;;  %p493_p9 = scmp.lt.u32.totalorder %s489_s28, %s639_s1 }
  0x16   :  { %p495_p10 = pnand %p493_p9, %p490_p8 }
  0x18   :  { %498 = shalt.err (!%p495_p10)
}
  0x19   :  { %s499_s6 = scalar_lea.vmem %s566_s15, 3072  ;;  %p504_p12 = scmp.lt.s32.totalorder %s566_s15, %s566_s15 }
  0x1a   :  { %p500_p11 = scmp.ne.s32.totalorder %s566_s15, %s499_s6  ;;  %p505_p13 = scmp.lt.s32.totalorder %s499_s6, %s499_s6 }
  0x1c   :  { %p506_p0 = por %p505_p13, %p504_p12 }
  0x1e   :  { %p507_p1 = pnand %p506_p0, %p500_p11 }
  0x20   :  { %510 = shalt.err (!%p507_p1)
}
  0x21   :  { %s541_s0 = smov 64   ;;  %s542_s7 = smov 4  }
  0x22   :  { %32 = dma.hbm_to_vmem [thread:$0]  %s639_s1, 3072, %s566_s15, [#allocation6], %s541_s0, %s541_s0, %s542_s7  }
  0x23   :  { %533 = dma.done.wait [#allocation3], 128  }
  0x24   :  { %534 = vsyncadd [#allocation3], 4294967168 }
  0x25   :  { %535 = dma.done.wait [#allocation6], 3072  }
  0x26   :  { %536 = vsyncadd [#allocation6], 4294964224  ;;  %v543_v0 = vmov 0.0   ;;  %vm544_vm0 = vmmov 0   ;;  %v450_v1 = vld [vmem:[#allocation5] sm:$0xff]   ;;  %v42_v2 = vld [vmem:[#allocation2] sm:$0xff] }
  0x27   :  { %397 = vmatprep.subr.bf16.mxu0 %v543_v0  ;;  %399 = vmatprep.mubr.msk.bf16.mxu0 %vm544_vm0, %v543_v0  ;;  %v46_v3 = vpack.c.bf16 %v42_v2, %v42_v2  ;;  %vm59_vm1 = vcmask 130048   ;;  %v451_v4 = vld [vmem:[#allocation5 + $0x40] sm:$0xff]   ;;  %v452_v5 = vld [vmem:[#allocation5 + $0x48] sm:$0xff]   ;;  %v453_v6 = vld [vmem:[#allocation5 + $0x50] sm:$0xff]   ;;  %s545_s15 = smov [#allocation7]  }
  0x28   :  { %403 = vmatprep.subr.bf16.mxu1 %v543_v0  ;;  %419 = vmatprep.mubr.msk.bf16.mxu1 %vm544_vm0, %v543_v0  ;;  %v454_v7 = vld [vmem:[#allocation5 + $0x58] sm:$0xff]   ;;  %v455_v8 = vld [vmem:[#allocation5 + $0x60] sm:$0xff]   ;;  %v456_v9 = vld [vmem:[#allocation5 + $0x68] sm:$0xff]   ;;  %s344_s16 = sshll.u32 %s545_s15, 4  ;;  %s345_s16 = int_to_ptr.vmem [resolvable:$true] %s344_s16 }
  0x29   :  { %398 = vmatpush3.bf16.msra.mxu0 %v450_v1  ;;  %404 = vmatpush3.bf16.msra.mxu1 %v451_v4  ;;  %v457_v10 = vld [vmem:[#allocation5 + $0x70] sm:$0xff]   ;;  %v458_v11 = vld [vmem:[#allocation5 + $0x78] sm:$0xff]   ;;  %v459_v12 = vld [vmem:[#allocation5 + $0x80] sm:$0xff]   ;;  %s511_s17 = scalar_lea.vmem %s345_s16, 128  ;;  %p516_p3 = scmp.lt.s32.totalorder %s345_s16, %s345_s16 }
  0x2a   :  { %423 = vmatprep.subr.bf16.mxu0 %v543_v0  ;;  %405 = vmatprep.subr.bf16.mxu1 %v543_v0  ;;  %v460_v13 = vld [vmem:[#allocation5 + $0x88] sm:$0xff]   ;;  %v461_v14 = vld [vmem:[#allocation5 + $0x90] sm:$0xff]   ;;  %v462_v15 = vld [vmem:[#allocation5 + $0x98] sm:$0xff]   ;;  %p512_p2 = scmp.ne.s32.totalorder %s345_s16, %s511_s17  ;;  %p517_p4 = scmp.lt.s32.totalorder %s511_s17, %s511_s17 }
  0x2b   :  { %v463_v16 = vld [vmem:[#allocation5 + $0xa0] sm:$0xff]   ;;  %v464_v17 = vld [vmem:[#allocation5 + $0xa8] sm:$0xff]   ;;  %v354_v18 = vld [vmem:[%s640_s2] ss:$0 sm:$0xff] }
  0x2c   :  { %400 = vmatmul.mubr.msk.bf16.vlgmr.msra.gmra.mrb[0].mxu0 %vm59_vm1, %v46_v3  ;;  %v465_v27 = vld [vmem:[#allocation5 + $0xb0] sm:$0xff]   ;;  %v466_v28 = vld [vmem:[#allocation5 + $0xb8] sm:$0xff]   ;;  %p518_p5 = por %p517_p4, %p516_p3 }
  0x2d   :  { %439 = vmatprep.mubr.msk.bf16.mxu0 %vm544_vm0, %v543_v0  ;;  %406 = vmatpush3.bf16.msra.mxu1 %v452_v5  ;;  %v358_v29 = vld [vmem:[%s640_s2 + $0x1] ss:$0 sm:$0xff]  ;;  %v368_v38 = vld [vmem:[%s640_s2 + $0x2] ss:$0 sm:$0xff] }
  0x2e   :  { %407 = vmatprep.subr.bf16.mxu1 %v543_v0  ;;  %424 = vmatpush3.bf16.msra.mxu0 %v459_v12  ;;  %p519_p6 = pnand %p518_p5, %p512_p2 }
  0x2f   :  { %425 = vmatprep.subr.bf16.mxu0 %v543_v0 }
  0x31   :  { %408 = vmatpush3.bf16.msra.mxu1 %v453_v6 }
  0x32   :  { %409 = vmatprep.subr.bf16.mxu1 %v543_v0  ;;  %426 = vmatpush3.bf16.msra.mxu0 %v460_v13 }
  0x33   :  { %427 = vmatprep.subr.bf16.mxu0 %v543_v0 }
  0x35   :  { %410 = vmatpush3.bf16.msra.mxu1 %v454_v7 }
  0x36   :  { %411 = vmatprep.subr.bf16.mxu1 %v543_v0  ;;  %428 = vmatpush3.bf16.msra.mxu0 %v461_v14 }
  0x37   :  { %429 = vmatprep.subr.bf16.mxu0 %v543_v0 }
  0x39   :  { %412 = vmatpush3.bf16.msra.mxu1 %v455_v8 }
  0x3a   :  { %413 = vmatprep.subr.bf16.mxu1 %v543_v0  ;;  %430 = vmatpush3.bf16.msra.mxu0 %v462_v15 }
  0x3b   :  { %431 = vmatprep.subr.bf16.mxu0 %v543_v0 }
  0x3d   :  { %414 = vmatpush3.bf16.msra.mxu1 %v456_v9 }
  0x3e   :  { %415 = vmatprep.subr.bf16.mxu1 %v543_v0  ;;  %432 = vmatpush3.bf16.msra.mxu0 %v463_v16 }
  0x3f   :  { %433 = vmatprep.subr.bf16.mxu0 %v543_v0 }
  0x41   :  { %416 = vmatpush3.bf16.msra.mxu1 %v457_v10 }
  0x42   :  { %417 = vmatprep.subr.bf16.mxu1 %v543_v0  ;;  %434 = vmatpush3.bf16.msra.mxu0 %v464_v17 }
  0x43   :  { %435 = vmatprep.subr.bf16.mxu0 %v543_v0 }
  0x45   :  { %418 = vmatpush3.bf16.msra.mxu1 %v458_v11 }
  0x46   :  { %436 = vmatpush3.bf16.msra.mxu0 %v465_v27 }
  0x47   :  { %437 = vmatprep.subr.bf16.mxu0 %v543_v0 }
  0x4a   :  { %438 = vmatpush3.bf16.msra.mxu0 %v466_v28 }
  0xff   :  { %v97_v19 = vpop.f32.mrb[0].mxu0 }
 0x100   :  { %v98_v20 = vadd.f32 %v354_v18, %v97_v19  ;;  %v401_v21 = vpop.f32.mrb[1].mxu0 }
 0x101   :  { %v100_v22 = vpop.f32.mrb[2].mxu0 }
 0x102   :  { %vm103_vm2 = vcmp.ge.f32.partialorder %v98_v20, 0.0  ;;  %v104_v23 = vmul.f32 0.1, %v98_v20  ;;  %v402_v24 = vpop.f32.mrb[3].mxu0 }
 0x104   :  { %v105_v25 = vsel %vm103_vm2, %v98_v20, %v104_v23 }
 0x105   :  { %v125_v26 = vpack.c.bf16 %v105_v25, %v105_v25 }
 0x107   :  { %420 = vmatmul.mubr.bf16.vlgmr.msra.gmra.mrb[0].mxu1 %v125_v26 }
 0x1da   :  { %v214_v30 = vpop.f32.mrb[0].mxu1 }
 0x1db   :  { %v215_v31 = vadd.f32 %v358_v29, %v214_v30  ;;  %v421_v32 = vpop.f32.mrb[1].mxu1 }
 0x1dc   :  { %v217_v33 = vpop.f32.mrb[2].mxu1 }
 0x1dd   :  { %vm220_vm3 = vcmp.ge.f32.partialorder %v215_v31, 0.0  ;;  %v221_v34 = vmul.f32 0.1, %v215_v31  ;;  %v422_v35 = vpop.f32.mrb[3].mxu1 }
 0x1df   :  { %v222_v36 = vsel %vm220_vm3, %v215_v31, %v221_v34 }
 0x1e0   :  { %v242_v37 = vpack.c.bf16 %v222_v36, %v222_v36 }
 0x1e2   :  { %440 = vmatmul.mubr.bf16.vlgmr.msra.gmra.mrb[4].mxu0 %v242_v37 }
 0x2b5   :  { %v331_v39 = vpop.f32.mrb[4].mxu0 }
 0x2b6   :  { %v332_v40 = vadd.f32 %v368_v38, %v331_v39  ;;  %v441_v41 = vpop.f32.mrb[5].mxu0 }
 0x2b7   :  { %v334_v42 = vpop.f32.mrb[6].mxu0 }
 0x2b8   :  { %337 = vst [vmem:[#allocation7] sm:$0xff] %v332_v40  ;;  %v442_v43 = vpop.f32.mrb[7].mxu0 }
 0x2b9   :  { %522 = shalt.err (!%p519_p6)
}
 0x2ba   :  { %s523_s2 = scalar_lea.hbm %s641_s3, 128 }
 0x2bb   :  { %p524_p7 = scmp.ne.s32.totalorder %s641_s3, %s523_s2  ;;  %p527_p8 = scmp.lt.u32.totalorder %s523_s2, %s641_s3 }
 0x2bd   :  { %p529_p9 = pnand %p527_p8, %p524_p7 }
 0x2bf   :  { %532 = shalt.err (!%p529_p9)
}
 0x2c0   :  { %347 = dma.vmem_to_hbm [thread:$0]  %s345_s16, 128, %s641_s3, [#allocation4]  }
 0x2c1   :  { %537 = dma.done.wait [#allocation4], 128  }
 0x2c2   :  { %538 = vsyncadd [#allocation4], 4294967168 }
 0x2c3   :  { %351 = vsyncpa [#allocation3], 1 }
 0x2c4   :  { %352 = vsyncpa [#allocation6], 1 }
 0x2c5   :  { %353 = vsyncpa [#allocation4], 1 }

</bundles_post_ra>
